<compile_context>
chip_gen: v7x
topology: tpu7x:2x2x1
jax: 0.10.0
libtpu: 0.0.40
codegen_flags: <defaults>
</compile_context>

<pallas_src>
import functools

import jax
import jax.numpy as jnp
from jax.experimental import pallas as pl
from jax.experimental.pallas import tpu as pltpu


def _round_up(x, m):
    return (x + m - 1) // m * m


def _cdiv(a, b):
    return -(-a // b)


def _tensorcores_per_chip():
    """Best-effort TensorCores-per-chip (2 on v7x, else 1)."""
    try:
        kind = jax.devices()[0].device_kind.lower()
    except Exception:
        return 1
    return 2 if ("v7" in kind or "7x" in kind) else 1


def _choose_tn(n, a_pad, itembytes, budget_bytes):
    """Rows per tile so 2 inputs * 2 pipeline buffers fit the VMEM budget."""
    rows = max(budget_bytes // (4 * a_pad * itembytes), 8)
    if rows >= 128:
        rows = (rows // 128) * 128     # lane-aligned starts for big tiles
    else:
        rows = max((rows // 8) * 8, 8)
    if n <= rows:
        return _round_up(n, 8)         # single tile covers the whole batch
    return rows


def _pv_loss_kernel(p_hat_ref, pi_ref, vz_ref, out_ref, acc_ref, *,
                    n, tn, spc, inv_n):
    c = pl.program_id(0)               # core split
    i = pl.program_id(1)               # row-tile step within this core

    @pl.when(i == 0)
    def _init():
        acc_ref[...] = jnp.zeros_like(acc_ref)

    # ---- Policy term: sum over valid rows of sum_a pi * p_hat (p_hat = log p).
    prod = p_hat_ref[...].astype(jnp.float32) * pi_ref[...].astype(jnp.float32)
    start = (c * spc + i) * tn         # UNclamped global row offset of this block
    row_ids = jax.lax.broadcasted_iota(jnp.int32, (tn, 1), 0)
    prod = jnp.where(start + row_ids < n, prod, 0.0)       # tail / overhang mask
    acc_ref[...] += jnp.sum(prod, axis=0, keepdims=True)   # (1, A) partial

    @pl.when(i == pl.num_programs(1) - 1)
    def _finalize():
        pol = jnp.sum(acc_ref[...])
        # Value term: the whole (2, N) slab is resident; compute it once.
        vz = vz_ref[...].astype(jnp.float32)
        diff = vz[0:1, :] - vz[1:2, :]
        val = jnp.where(c == 0, jnp.sum(diff * diff), 0.0)  # only core 0 adds it
        out_ref[...] = ((val - pol) * inv_n).reshape(1, 1, 1)


def policy_value_loss(p_hat, pi, value, z, *,
                      vmem_stream_budget=24 * 1024 * 1024,
                      num_tensorcores=None):
    """p_hat, pi: (N, A) (p_hat are log-probs); value, z: (N,) -> scalar f32."""
    n, a = p_hat.shape
    assert pi.shape == (n, a) and value.shape == (n,) and z.shape == (n,)

    itembytes = max(jnp.dtype(p_hat.dtype).itemsize, jnp.dtype(pi.dtype).itemsize)
    a_pad = _round_up(a, 128)                      # VMEM lane layout width (no HBM pad)
    tn = _choose_tn(n, a_pad, itembytes, vmem_stream_budget)
    total_steps = _cdiv(n, tn)

    splits = int(num_tensorcores) if num_tensorcores is not None else _tensorcores_per_chip()
    splits = max(1, min(splits, 2))
    if total_steps < 2:
        splits = 1
    spc = _cdiv(total_steps, splits)               # steps per core
    last_block = total_steps - 1

    # value/z: one small lane-dense slab, fully resident in VMEM.
    vz = jnp.concatenate([value.reshape(1, n), z.reshape(1, n)], axis=0)

    def big_map(c, i):                             # clamp overhang blocks in-bounds
        return (jnp.minimum(c * spc + i, last_block), 0)

    kernel = functools.partial(_pv_loss_kernel, n=n, tn=tn, spc=spc, inv_n=1.0 / n)

    # VMEM footprint: double-buffered input streams + resident vz + scratch + slack.
    stream_bytes = 2 * 2 * tn * a_pad * itembytes
    vz_bytes = 2 * 8 * _round_up(n, 128) * jnp.dtype(vz.dtype).itemsize
    misc_bytes = 8 * a_pad * 4 + (2 << 20)
    vmem_limit = int(min(max(stream_bytes + vz_bytes + misc_bytes, 16 << 20), 60 << 20))

    out = pl.pallas_call(
        kernel,
        out_shape=jax.ShapeDtypeStruct((splits, 1, 1), jnp.float32),
        grid=(splits, spc),
        in_specs=[
            pl.BlockSpec((tn, a), big_map),                 # p_hat rows, true A
            pl.BlockSpec((tn, a), big_map),                 # pi rows, true A
            pl.BlockSpec((2, n), lambda c, i: (0, 0)),      # value/z slab, resident
        ],
        out_specs=pl.BlockSpec((1, 1, 1), lambda c, i: (c, 0, 0)),
        scratch_shapes=[pltpu.VMEM((1, a), jnp.float32)],   # policy partial sums
        compiler_params=pltpu.CompilerParams(
            dimension_semantics=("parallel", "arbitrary"),
            vmem_limit_bytes=vmem_limit,
        ),
    )(p_hat, pi, vz)
    return jnp.sum(out)


def _reference_loss(p_hat, pi, value, z):
    value_loss = jnp.mean((value - z) ** 2)
    policy_loss = -jnp.mean(jnp.sum(pi * p_hat, axis=1))
    return value_loss + policy_loss


if __name__ == "__main__":
    def make_inputs(key, n, board_len):
        a = board_len * board_len
        k1, k2, k3, k4 = jax.random.split(key, 4)
        p_hat = jax.nn.log_softmax(
            jax.random.normal(k1, (n, a), jnp.float32), axis=1)
        pi = jax.nn.softmax(jax.random.normal(k2, (n, a), jnp.float32), axis=1)
        value = jnp.tanh(jax.random.normal(k3, (n,), jnp.float32))
        z = jnp.tanh(jax.random.normal(k4, (n,), jnp.float32))
        return p_hat, pi, value, z

    # Small case: N=8, board 8x8 (A=64), single tile, single core.
    p_hat, pi, value, z = make_inputs(jax.random.PRNGKey(0), 8, 8)
    loss = policy_value_loss(p_hat, pi, value, z)
    jax.block_until_ready(loss)
    ref = _reference_loss(p_hat, pi, value, z)
    assert jnp.allclose(loss, ref, atol=1e-4, rtol=1e-4), (loss, ref)

    # Larger case: N=600, board 19x19 (A=361); default budget => one big tile.
    inputs2 = make_inputs(jax.random.PRNGKey(1), 600, 19)
    loss2 = policy_value_loss(*inputs2)
    jax.block_until_ready(loss2)
    ref2 = _reference_loss(*inputs2)
    assert jnp.allclose(loss2, ref2, atol=1e-4, rtol=1e-4), (loss2, ref2)

    # Tiny VMEM budget to force the multi-tile path with a ragged tail
    # (in-kernel tail-row masking), single core split.
    loss3 = policy_value_loss(*inputs2, vmem_stream_budget=1 << 20,
                              num_tensorcores=1)
    jax.block_until_ready(loss3)
    assert jnp.allclose(loss3, ref2, atol=1e-4, rtol=1e-4), (loss3, ref2)

    # Forced 2-way core split with an odd step count: exercises the clamped,
    # fully-masked overhang block and the summed per-core partial outputs.
    loss4 = policy_value_loss(*inputs2, vmem_stream_budget=1 << 20,
                              num_tensorcores=2)
    jax.block_until_ready(loss4)
    assert jnp.allclose(loss4, ref2, atol=1e-4, rtol=1e-4), (loss4, ref2)

    print("KERNEL_OK")
</pallas_src>

<mosaic_0001>
module attributes {stable_mosaic.version = 11 : i64} {
  func.func @_pv_loss_kernel(%arg0: i32, %arg1: i32, %arg2: memref<8x64xf32, #tpu.memory_space<vmem>>, %arg3: memref<8x64xf32, #tpu.memory_space<vmem>>, %arg4: memref<2x8xf32, #tpu.memory_space<vmem>>, %arg5: memref<1x1x1xf32, #tpu.memory_space<vmem>>, %arg6: memref<1x64xf32, #tpu.memory_space<vmem>>) attributes {dimension_semantics = [#tpu.dimension_semantics<parallel>, #tpu.dimension_semantics<arbitrary>], iteration_bounds = array<i64: 1, 1>, scalar_prefetch = 0 : i64, scratch_operands = 1 : i64, tpu.core_type = #tpu.core_type<tc>, window_params = [{transform_indices = @transform_0, window_bounds = array<i64: 8, 64>}, {transform_indices = @transform_1, window_bounds = array<i64: 8, 64>}, {pipeline_mode = #tpu.pipeline_mode<synchronous>, transform_indices = @transform_2, window_bounds = array<i64: 2, 8>}, {transform_indices = @transform_3, window_bounds = array<i64: 1, 1, 1>}]} {
    %c0_i32 = arith.constant 0 : i32
    %0 = arith.cmpi eq, %arg1, %c0_i32 : i32
    %1 = arith.extui %0 : i1 to i32
    %c0_i32_0 = arith.constant 0 : i32
    %2 = arith.cmpi ne, %1, %c0_i32_0 : i32
    scf.if %2 {
      %cst_12 = arith.constant 0.000000e+00 : f32
      %26 = vector.broadcast %cst_12 : f32 to vector<1x64xf32>
      %c0_13 = arith.constant 0 : index
      %c0_14 = arith.constant 0 : index
      %27 = vector.load %arg6[%c0_13, %c0_14] : memref<1x64xf32, #tpu.memory_space<vmem>>, vector<1x64xf32>
      tpu.vector_store %arg6[%c0_13, %c0_14], %26 {strides = array<i32>} : memref<1x64xf32, #tpu.memory_space<vmem>>, vector<1x64xf32>,
    } else {
    }
    %c0 = arith.constant 0 : index
    %c0_1 = arith.constant 0 : index
    %3 = vector.load %arg2[%c0, %c0_1] : memref<8x64xf32, #tpu.memory_space<vmem>>, vector<8x64xf32>
    %c0_2 = arith.constant 0 : index
    %c0_3 = arith.constant 0 : index
    %4 = vector.load %arg3[%c0_2, %c0_3] : memref<8x64xf32, #tpu.memory_space<vmem>>, vector<8x64xf32>
    %5 = arith.mulf %3, %4 : vector<8x64xf32>
    %c1_i32 = arith.constant 1 : i32
    %6 = arith.muli %arg0, %c1_i32 : i32
    %7 = arith.addi %6, %arg1 : i32
    %c8_i32 = arith.constant 8 : i32
    %8 = arith.muli %7, %c8_i32 : i32
    %9 = tpu.iota {dimensions = array<i32: 0>} : vector<8x1xi32>
    %10 = vector.broadcast %8 : i32 to vector<8x1xi32>
    %11 = arith.addi %10, %9 : vector<8x1xi32>
    %c8_i32_4 = arith.constant 8 : i32
    %12 = vector.broadcast %c8_i32_4 : i32 to vector<8x1xi32>
    %13 = arith.cmpi slt, %11, %12 : vector<8x1xi32>
    %cst = arith.constant 0.000000e+00 : f32
    %14 = vector.shape_cast %13 : vector<8x1xi1> to vector<8x1xi1>
    %15 = vector.broadcast %14 : vector<8x1xi1> to vector<8x64xi1>
    %16 = vector.broadcast %cst : f32 to vector<8x64xf32>
    %17 = arith.select %15, %5, %16 : vector<8x64xi1>, vector<8x64xf32>
    %c0_5 = arith.constant 0 : index
    %c0_6 = arith.constant 0 : index
    %18 = vector.load %arg6[%c0_5, %c0_6] : memref<1x64xf32, #tpu.memory_space<vmem>>, vector<1x64xf32>
    %cst_7 = arith.constant dense<0.000000e+00> : vector<64xf32>
    %19 = vector.multi_reduction <add>, %17, %cst_7 [0] : vector<8x64xf32> to vector<64xf32>
    %20 = vector.shape_cast %19 : vector<64xf32> to vector<1x64xf32>
    %21 = arith.addf %18, %20 : vector<1x64xf32>
    %c0_8 = arith.constant 0 : index
    %c0_9 = arith.constant 0 : index
    %22 = vector.load %arg6[%c0_8, %c0_9] : memref<1x64xf32, #tpu.memory_space<vmem>>, vector<1x64xf32>
    tpu.vector_store %arg6[%c0_8, %c0_9], %21 {strides = array<i32>} : memref<1x64xf32, #tpu.memory_space<vmem>>, vector<1x64xf32>,
    %c0_i32_10 = arith.constant 0 : i32
    %23 = arith.cmpi eq, %arg1, %c0_i32_10 : i32
    %24 = arith.extui %23 : i1 to i32
    %c0_i32_11 = arith.constant 0 : i32
    %25 = arith.cmpi ne, %24, %c0_i32_11 : i32
    scf.if %25 {
      %c0_12 = arith.constant 0 : index
      %c0_13 = arith.constant 0 : index
      %26 = vector.load %arg6[%c0_12, %c0_13] : memref<1x64xf32, #tpu.memory_space<vmem>>, vector<1x64xf32>
      %27 = vector.shape_cast %26 : vector<1x64xf32> to vector<1x1x64xf32>
      %cst_14 = arith.constant dense<0.000000e+00> : vector<1xf32>
      %28 = vector.multi_reduction <add>, %27, %cst_14 [1, 2] : vector<1x1x64xf32> to vector<1xf32>
      %29 = vector.shape_cast %28 : vector<1xf32> to vector<1x1x1xf32>
      %30 = vector.extract %29[0, 0, 0] : f32 from vector<1x1x1xf32>
      %c0_15 = arith.constant 0 : index
      %c0_16 = arith.constant 0 : index
      %31 = vector.load %arg4[%c0_15, %c0_16] : memref<2x8xf32, #tpu.memory_space<vmem>>, vector<2x8xf32>
      %32 = vector.extract_strided_slice %31 {offsets = [0, 0], sizes = [1, 8], strides = [1, 1]} : vector<2x8xf32> to vector<1x8xf32>
      %33 = vector.extract_strided_slice %31 {offsets = [1, 0], sizes = [1, 8], strides = [1, 1]} : vector<2x8xf32> to vector<1x8xf32>
      %34 = arith.subf %32, %33 : vector<1x8xf32>
      %c0_i32_17 = arith.constant 0 : i32
      %35 = arith.cmpi eq, %arg0, %c0_i32_17 : i32
      %36 = arith.mulf %34, %34 : vector<1x8xf32>
      %37 = vector.shape_cast %36 : vector<1x8xf32> to vector<1x1x8xf32>
      %cst_18 = arith.constant dense<0.000000e+00> : vector<1xf32>
      %38 = vector.multi_reduction <add>, %37, %cst_18 [1, 2] : vector<1x1x8xf32> to vector<1xf32>
      %39 = vector.shape_cast %38 : vector<1xf32> to vector<1x1x1xf32>
      %40 = vector.extract %39[0, 0, 0] : f32 from vector<1x1x1xf32>
      %cst_19 = arith.constant 0.000000e+00 : f32
      %41 = arith.select %35, %40, %cst_19 : f32
      %42 = arith.subf %41, %30 : f32
      %cst_20 = arith.constant 1.250000e-01 : f32
      %43 = arith.mulf %42, %cst_20 : f32
      %44 = vector.broadcast %43 : f32 to vector<1x1x1xf32>
      %c0_21 = arith.constant 0 : index
      %c0_22 = arith.constant 0 : index
      %c0_23 = arith.constant 0 : index
      %45 = vector.load %arg5[%c0_21, %c0_22, %c0_23] : memref<1x1x1xf32, #tpu.memory_space<vmem>>, vector<1x1x1xf32>
      tpu.vector_store %arg5[%c0_21, %c0_22, %c0_23], %44 {strides = array<i32>} : memref<1x1x1xf32, #tpu.memory_space<vmem>>, vector<1x1x1xf32>,
    } else {
    }
    return
  }
  func.func @transform_0(%arg0: i32, %arg1: i32) -> (i32, i32) {
    %c1_i32 = arith.constant 1 : i32
    %0 = arith.muli %arg0, %c1_i32 : i32
    %1 = arith.addi %0, %arg1 : i32
    %c0_i32 = arith.constant 0 : i32
    %2 = arith.minsi %1, %c0_i32 : i32
    %c0_i32_0 = arith.constant 0 : i32
    %c0_i32_1 = arith.constant 0 : i32
    return %2, %c0_i32_0 : i32, i32
  }
  func.func @transform_1(%arg0: i32, %arg1: i32) -> (i32, i32) {
    %c1_i32 = arith.constant 1 : i32
    %0 = arith.muli %arg0, %c1_i32 : i32
    %1 = arith.addi %0, %arg1 : i32
    %c0_i32 = arith.constant 0 : i32
    %2 = arith.minsi %1, %c0_i32 : i32
    %c0_i32_0 = arith.constant 0 : i32
    %c0_i32_1 = arith.constant 0 : i32
    return %2, %c0_i32_0 : i32, i32
  }
  func.func @transform_2(%arg0: i32, %arg1: i32) -> (i32, i32) {
    %c0_i32 = arith.constant 0 : i32
    %c0_i32_0 = arith.constant 0 : i32
    %c0_i32_1 = arith.constant 0 : i32
    return %c0_i32, %c0_i32_0 : i32, i32
  }
  func.func @transform_3(%arg0: i32, %arg1: i32) -> (i32, i32, i32) {
    %c0_i32 = arith.constant 0 : i32
    %c0_i32_0 = arith.constant 0 : i32
    %c0_i32_1 = arith.constant 0 : i32
    return %arg0, %c0_i32, %c0_i32_0 : i32, i32, i32
  }
}

</mosaic_0001>

<bundles_post_ra>
// kernel: tpu_custom_call.1
= control target key start
LH: loop header
LB: loop body
LE: loop exit
PB: predicated region body
PF: predicated region fallthrough
CT: control target
= control target key end

     0   :  { %8 = vsyncpa [#allocation4], 0  ;;  %s290_s0 = inlined_call_operand.hbm [shape: f32[8,64], index: 0, kind: input, shape index: {}]   ;;  %s291_s1 = inlined_call_operand.hbm [shape: f32[8,64], index: 1, kind: input, shape index: {}]   ;;  %s292_s2 = inlined_call_operand.vmem [shape: f32[2,8], index: 2, kind: input, shape index: {}]   ;;  %s293_s3 = inlined_call_operand.hbm [shape: f32[1,1,1], index: 3, kind: output, shape index: {}]  }
   0x1   :  { %9 = vsyncpa [#allocation7], 0 }
   0x2   :  { %10 = vsyncpa [#allocation5], 0  ;;  %s224_s12 = smov [#allocation3]   ;;  %s225_s14 = smov [#allocation6]  }
   0x3   :  { %s22_s13 = sshll.u32 %s224_s12, 4  ;;  %s37_s15 = sshll.u32 %s225_s14, 4  ;;  %s23_s13 = int_to_ptr.vmem [resolvable:$true] %s22_s13  ;;  %s38_s15 = int_to_ptr.vmem [resolvable:$true] %s37_s15 }
   0x4   :  { %s152_s18 = scalar_lea.hbm %s290_s0, 128 }
   0x5   :  { %p153_p0 = scmp.ne.s32.totalorder %s290_s0, %s152_s18  ;;  %p156_p1 = scmp.lt.u32.totalorder %s152_s18, %s290_s0 }
   0x7   :  { %p158_p2 = pnand %p156_p1, %p153_p0 }
   0x9   :  { %161 = shalt.err (!%p158_p2)
}
   0xa   :  { %s162_s23 = scalar_lea.vmem %s23_s13, 128  ;;  %p167_p4 = scmp.lt.s32.totalorder %s23_s13, %s23_s13 }
   0xb   :  { %p163_p3 = scmp.ne.s32.totalorder %s23_s13, %s162_s23  ;;  %p168_p5 = scmp.lt.s32.totalorder %s162_s23, %s162_s23 }
   0xd   :  { %p169_p6 = por %p168_p5, %p167_p4 }
   0xf   :  { %p170_p7 = pnand %p169_p6, %p163_p3 }
  0x11   :  { %173 = shalt.err (!%p170_p7)
}
  0x12   :  { %25 = dma.hbm_to_vmem [thread:$0]  %s290_s0, 128, %s23_s13, [#allocation4]  }
  0x13   :  { %s174_s28 = scalar_lea.hbm %s291_s1, 128 }
  0x14   :  { %p175_p8 = scmp.ne.s32.totalorder %s291_s1, %s174_s28  ;;  %p178_p9 = scmp.lt.u32.totalorder %s174_s28, %s291_s1 }
  0x16   :  { %p180_p10 = pnand %p178_p9, %p175_p8 }
  0x18   :  { %183 = shalt.err (!%p180_p10)
}
  0x19   :  { %s184_s6 = scalar_lea.vmem %s38_s15, 128  ;;  %p189_p12 = scmp.lt.s32.totalorder %s38_s15, %s38_s15 }
  0x1a   :  { %p185_p11 = scmp.ne.s32.totalorder %s38_s15, %s184_s6  ;;  %p190_p13 = scmp.lt.s32.totalorder %s184_s6, %s184_s6 }
  0x1c   :  { %p191_p0 = por %p190_p13, %p189_p12 }
  0x1e   :  { %p192_p1 = pnand %p191_p0, %p185_p11 }
  0x20   :  { %195 = shalt.err (!%p192_p1)
}
  0x21   :  { %40 = dma.hbm_to_vmem [thread:$0]  %s291_s1, 128, %s38_s15, [#allocation7]  }
  0x22   :  { %218 = dma.done.wait [#allocation4], 128  }
  0x23   :  { %219 = vsyncadd [#allocation4], 4294967168 }
  0x24   :  { %220 = dma.done.wait [#allocation7], 128  }
  0x25   :  { %221 = vsyncadd [#allocation7], 4294967168  ;;  %vm59_vm0 = vcmask 516096   ;;  %v226_v0 = vmov 0.0   ;;  %v61_v1 = vld [vmem:[#allocation3] sm:$0xff]  ;;  %v62_v2 = vld [vmem:[#allocation6] sm:$0xff] }
  0x26   :  { %60 = vst.msk [vmem:[#allocation2] sm:$0x1] %vm59_vm0, %v226_v0  ;;  %vm75_vm1 = vcmask 523264   ;;  %v63_v3 = vmul.f32 %v62_v2, %v61_v1  ;;  %v100_v11 = vld [vmem:[%s292_s2] sm:$0x3]  ;;  %vm107_vm2 = vcmask 57344  }
  0x27   :  { %v102_v14 = vrot.slane %v100_v11, 1  ;;  %s227_s11 = smov [#allocation8]   ;;  %vm122_vm3 = vcmask 0  }
  0x28   :  { %v76_v4 = vsel %vm75_vm1, %v63_v3, 0.0  ;;  %s130_s12 = sshll.u32 %s227_s11, 4  ;;  %s131_s12 = int_to_ptr.vmem [resolvable:$true] %s130_s12 }
  0x29   :  { %v77_v5 = vrot.slane %v76_v4, 4  ;;  %v104_v15 = vsub.f32 %v100_v11, %v102_v14  ;;  %s196_s14 = scalar_lea.vmem %s131_s12, 16  ;;  %s200_s15 = scalar_lea.vmem %s131_s12, 32 }
  0x2a   :  { %p197_p2 = scmp.ne.s32.totalorder %s131_s12, %s196_s14  ;;  %p201_p3 = scmp.lt.s32.totalorder %s131_s12, %s131_s12 }
  0x2b   :  { %v78_v6 = vadd.f32 %v77_v5, %v76_v4  ;;  %v106_v16 = vmul.f32 %v104_v15, %v104_v15  ;;  %p202_p4 = scmp.lt.s32.totalorder %s200_s15, %s196_s14 }
  0x2d   :  { %v79_v7 = vrot.slane %v78_v6, 2  ;;  %v74_v10 = vld [vmem:[#allocation2] sm:$0x1]  ;;  %v108_v19 = vsel %vm107_vm2, %v106_v16, 0.0  ;;  %p203_p5 = por %p202_p4, %p201_p3 }
  0x2f   :  { %v80_v8 = vadd.f32 %v79_v7, %v78_v6  ;;  %p204_p6 = pnand %p203_p5, %p197_p2 }
  0x31   :  { %v81_v9 = vrot.slane %v80_v8, 1 }
  0x33   :  { %v82_v12 = vadd.f32 %v81_v9, %v80_v8 }
  0x35   :  { %v83_v13 = vadd.f32 %v82_v12, %v74_v10 }
  0x37   :  { %85 = vst.msk [vmem:[#allocation2] sm:$0x1] %vm59_vm0, %v83_v13 }
  0x3e   :  { %v89_v17 = vld [vmem:[#allocation2] sm:$0x1] }
  0x3f   :  { %v90_v18 = vsel %vm59_vm0, %v89_v17, 0.0 }
  0x40   :  { %91 = vadd.xlane.f32.xlu0 %v90_v18 }
  0x44   :  { %109 = vadd.xlane.f32.xlu0 %v108_v19 }
  0xcd   :  { %v92_v20 = vpop.xlane.xlu0 %91 }
  0xce   :  { %v93_v21 = vrot.slane %v92_v20, 4 }
  0xd0   :  { %v94_v22 = vadd.f32 %v93_v21, %v92_v20 }
  0xd1   :  { %v110_v23 = vpop.xlane.xlu0 %109 }
  0xd2   :  { %v95_v24 = vrot.slane %v94_v22, 2  ;;  %v111_v25 = vrot.slane %v110_v23, 4 }
  0xd4   :  { %v112_v26 = vadd.f32 %v111_v25, %v110_v23  ;;  %v96_v27 = vadd.f32 %v95_v24, %v94_v22 }
  0xd6   :  { %v113_v28 = vrot.slane %v112_v26, 2  ;;  %v97_v29 = vrot.slane %v96_v27, 1 }
  0xd8   :  { %v114_v30 = vadd.f32 %v113_v28, %v112_v26  ;;  %v98_v31 = vadd.f32 %v97_v29, %v96_v27 }
  0xda   :  { %144 = vpush %v98_v31  ;;  %v115_v32 = vrot.slane %v114_v30, 1 }
  0xdc   :  { %v116_v33 = vadd.f32 %v115_v32, %v114_v30 }
  0xde   :  { %146 = vpush %v116_v33 }
 0x10b   :  { %s145_s2 = spop %144 }
 0x10f   :  { %s147_s9 = spop %146 }
 0x110   :  { %s119_s10 = ssub.f32 %s147_s9, %s145_s2 }
 0x112   :  { %s120_s13 = smul.f32 0.125, %s119_s10 }
 0x114   :  { %v121_v34 = vstv %s120_s13 }
 0x115   :  { %123 = vst.msk [vmem:[#allocation8] sm:$0x1] %vm122_vm3, %v121_v34 }
 0x116   :  { %207 = shalt.err (!%p204_p6)
}
 0x117   :  { %s208_s18 = scalar_lea.hbm %s293_s3, 16 }
 0x118   :  { %p209_p7 = scmp.ne.s32.totalorder %s293_s3, %s208_s18  ;;  %p212_p8 = scmp.lt.u32.totalorder %s208_s18, %s293_s3 }
 0x11a   :  { %p214_p9 = pnand %p212_p8, %p209_p7 }
 0x11c   :  { %217 = shalt.err (!%p214_p9)
}
 0x11d   :  { %133 = dma.vmem_to_hbm [thread:$0]  %s131_s12, 16, %s293_s3, [#allocation5]  }
 0x11e   :  { %222 = dma.done.wait [#allocation5], 16  }
 0x11f   :  { %223 = vsyncadd [#allocation5], 4294967280 }
 0x120   :  { %137 = vsyncpa [#allocation4], 1 }
 0x121   :  { %138 = vsyncpa [#allocation7], 1 }
 0x122   :  { %139 = vsyncpa [#allocation5], 1 }

</bundles_post_ra>
